<compile_context>
chip_gen: v7x
topology: tpu7x:2x2x1
jax: 0.10.0
libtpu: 0.0.40
codegen_flags: <defaults>
</compile_context>

<pallas_src>
from functools import partial

import jax
import jax.numpy as jnp
from jax.experimental import pallas as pl
from jax.experimental.pallas import tpu as pltpu

_LANE = 128
_SUBLANE = 8


def _round_up(n: int, m: int) -> int:
    return ((n + m - 1) // m) * m


def _mlp_kernel(x_ref, w1_ref, w2_ref, o_ref):
    # Cast f32 input tile to bf16 on the VPU (free under DMA/MXU slack).
    x = x_ref[...].astype(w1_ref.dtype)
    # fc1 + ReLU: bf16 operands, f32 accumulation on the MXU.
    h = jnp.dot(x, w1_ref[...], preferred_element_type=jnp.float32)
    h = jnp.maximum(h, 0.0).astype(w2_ref.dtype)
    # fc2 + Sigmoid. Padded hidden cols are ReLU(0)=0 and hit zero w2 rows,
    # so they contribute nothing to the (unpadded) output columns.
    z = jnp.dot(h, w2_ref[...], preferred_element_type=jnp.float32)
    o_ref[...] = jax.nn.sigmoid(z).astype(o_ref.dtype)


def pack_weights(w1, w2, compute_dtype=jnp.bfloat16):
    """Pre-pack PyTorch-layout weights once (hoisted out of the call path).

    w1: (20, input_size)   -- fc1.weight (out, in)
    w2: (output_size, 20)  -- fc2.weight (out, in)
    Returns:
      w1_p: (input_size, hidden_p)   bf16, hidden padded to 128 lanes
      w2_p: (hidden_p, output_size)  bf16, zero rows for the padded hidden
    """
    hidden, in_features = w1.shape
    out_features = w2.shape[0]
    hidden_p = _round_up(hidden, _LANE)

    w1_p = jnp.zeros((in_features, hidden_p), compute_dtype).at[:, :hidden].set(
        jnp.transpose(w1).astype(compute_dtype))
    w2_p = jnp.zeros((hidden_p, out_features), compute_dtype).at[:hidden, :].set(
        jnp.transpose(w2).astype(compute_dtype))
    return w1_p, w2_p


def _pick_tile_b(batch: int, tile_b: int) -> int:
    """Choose a batch tile: big (amortize per-step overhead), 128-aligned when
    possible, capped by the batch, and capped so grid_b >= 2 when the batch is
    large enough (keeps both v7x TensorCores fed; no-op on v5e/v6e)."""
    b_ceil = _round_up(batch, _SUBLANE)
    tile_b = min(tile_b, b_ceil)
    if tile_b >= _LANE:
        tile_b = (tile_b // _LANE) * _LANE
    else:
        tile_b = _round_up(tile_b, _SUBLANE)
    if b_ceil >= 2 * _LANE:
        half = max(_LANE, (((b_ceil + 1) // 2) // _LANE) * _LANE)
        tile_b = min(tile_b, half)
    return tile_b


@partial(jax.jit, static_argnames=("tile_b",))
def base_classifier_forward(x, w1_p, w2_p, *, tile_b=4096):
    """Forward pass of BaseClassifier.

    x   : (B, input_size) float32 (cast to bf16 inside the kernel)
    w1_p: (input_size, hidden_p)  pre-packed by pack_weights
    w2_p: (hidden_p, output_size) pre-packed by pack_weights
    Returns (B, output_size) float32.
    """
    B, in_features = x.shape
    hidden_p = w1_p.shape[1]
    out_features = w2_p.shape[1]

    tb = _pick_tile_b(B, tile_b)
    grid_b = pl.cdiv(B, tb)

    return pl.pallas_call(
        _mlp_kernel,
        out_shape=jax.ShapeDtypeStruct((B, out_features), jnp.float32),
        grid=(grid_b,),
        in_specs=[
            pl.BlockSpec((tb, in_features), lambda i: (i, 0)),
            pl.BlockSpec((in_features, hidden_p), lambda i: (0, 0)),
            pl.BlockSpec((hidden_p, out_features), lambda i: (0, 0)),
        ],
        out_specs=pl.BlockSpec((tb, out_features), lambda i: (i, 0)),
        compiler_params=pltpu.CompilerParams(
            dimension_semantics=("parallel",),
        ),
    )(x, w1_p, w2_p)


if __name__ == "__main__":
    input_size = 32
    hidden = 20
    output_size = 10
    batch = 8

    key = jax.random.PRNGKey(0)
    kx, k1, k2 = jax.random.split(key, 3)

    # PyTorch-layout weights: fc1.weight (20, in), fc2.weight (out, 20).
    x = jax.random.normal(kx, (batch, input_size), dtype=jnp.float32)
    w1 = jax.random.normal(k1, (hidden, input_size), dtype=jnp.float32) * 0.1
    w2 = jax.random.normal(k2, (output_size, hidden), dtype=jnp.float32) * 0.1

    # Pack weights once; per-call path is the single jitted pallas_call.
    w1_p, w2_p = pack_weights(w1, w2)

    out = base_classifier_forward(x, w1_p, w2_p)
    jax.block_until_ready(out)
    assert out.shape == (batch, output_size)

    # Reference that mirrors the kernel's bf16-operand / f32-accumulate math.
    def _bf16(a):
        return a.astype(jnp.bfloat16).astype(jnp.float32)

    h_ref = jnp.maximum(_bf16(x) @ _bf16(w1).T, 0.0)
    ref_bf16 = jax.nn.sigmoid(_bf16(h_ref) @ _bf16(w2).T)
    assert jnp.allclose(out, ref_bf16, atol=1e-4), "mismatch vs bf16-matched reference"

    # Loose sanity check against the pure-f32 PyTorch-equivalent forward.
    ref_f32 = jax.nn.sigmoid(jnp.maximum(x @ w1.T, 0.0) @ w2.T)
    assert jnp.allclose(out, ref_f32, atol=3e-2), "mismatch vs f32 reference"

    print("KERNEL_OK")
</pallas_src>

<mosaic_0001>
module attributes {stable_mosaic.version = 11 : i64} {
  func.func @_mlp_kernel(%arg0: i32, %arg1: memref<8x32xf32, #tpu.memory_space<vmem>>, %arg2: memref<32x128xbf16, #tpu.memory_space<vmem>>, %arg3: memref<128x10xbf16, #tpu.memory_space<vmem>>, %arg4: memref<8x10xf32, #tpu.memory_space<vmem>>) attributes {dimension_semantics = [#tpu.dimension_semantics<parallel>], iteration_bounds = array<i64: 1>, scalar_prefetch = 0 : i64, scratch_operands = 0 : i64, tpu.core_type = #tpu.core_type<tc>, window_params = [{transform_indices = @transform_0, window_bounds = array<i64: 8, 32>}, {pipeline_mode = #tpu.pipeline_mode<synchronous>, transform_indices = @transform_1, window_bounds = array<i64: 32, 128>}, {pipeline_mode = #tpu.pipeline_mode<synchronous>, transform_indices = @transform_2, window_bounds = array<i64: 128, 10>}, {transform_indices = @transform_3, window_bounds = array<i64: 8, 10>}]} {
    %c0 = arith.constant 0 : index
    %c0_0 = arith.constant 0 : index
    %0 = vector.load %arg1[%c0, %c0_0] : memref<8x32xf32, #tpu.memory_space<vmem>>, vector<8x32xf32>
    %1 = arith.truncf %0 : vector<8x32xf32> to vector<8x32xbf16>
    %c0_1 = arith.constant 0 : index
    %c0_2 = arith.constant 0 : index
    %2 = vector.load %arg2[%c0_1, %c0_2] : memref<32x128xbf16, #tpu.memory_space<vmem>>, vector<32x128xbf16>
    %cst = arith.constant dense<0.000000e+00> : vector<8x128xf32>
    %3 = tpu.matmul %1, %2, %cst {dimension_numbers = #tpu.dot_dimension_numbers<[1], [0], [0], [1], [0, 0, 1, 1], [], []>} : vector<8x32xbf16>, vector<32x128xbf16>, vector<8x128xf32> -> vector<8x128xf32>
    %cst_3 = arith.constant 0.000000e+00 : f32
    %4 = vector.broadcast %cst_3 : f32 to vector<8x128xf32>
    %5 = arith.maximumf %3, %4 : vector<8x128xf32>
    %6 = arith.truncf %5 : vector<8x128xf32> to vector<8x128xbf16>
    %c0_4 = arith.constant 0 : index
    %c0_5 = arith.constant 0 : index
    %7 = vector.load %arg3[%c0_4, %c0_5] : memref<128x10xbf16, #tpu.memory_space<vmem>>, vector<128x10xbf16>
    %cst_6 = arith.constant dense<0.000000e+00> : vector<8x10xf32>
    %8 = tpu.matmul %6, %7, %cst_6 {dimension_numbers = #tpu.dot_dimension_numbers<[1], [0], [0], [1], [0, 0, 1, 1], [], []>} : vector<8x128xbf16>, vector<128x10xbf16>, vector<8x10xf32> -> vector<8x10xf32>
    %9 = arith.negf %8 : vector<8x10xf32>
    %10 = math.exp %9 : vector<8x10xf32>
    %cst_7 = arith.constant 1.000000e+00 : f32
    %11 = vector.broadcast %cst_7 : f32 to vector<8x10xf32>
    %12 = arith.addf %11, %10 : vector<8x10xf32>
    %13 = arith.divf %11, %12 : vector<8x10xf32>
    %c0_8 = arith.constant 0 : index
    %c0_9 = arith.constant 0 : index
    %14 = vector.load %arg4[%c0_8, %c0_9] : memref<8x10xf32, #tpu.memory_space<vmem>>, vector<8x10xf32>
    tpu.vector_store %arg4[%c0_8, %c0_9], %13 {strides = array<i32>} : memref<8x10xf32, #tpu.memory_space<vmem>>, vector<8x10xf32>,
    return
  }
  func.func @transform_0(%arg0: i32) -> (i32, i32) {
    %c0_i32 = arith.constant 0 : i32
    %c0_i32_0 = arith.constant 0 : i32
    return %arg0, %c0_i32 : i32, i32
  }
  func.func @transform_1(%arg0: i32) -> (i32, i32) {
    %c0_i32 = arith.constant 0 : i32
    %c0_i32_0 = arith.constant 0 : i32
    %c0_i32_1 = arith.constant 0 : i32
    return %c0_i32, %c0_i32_0 : i32, i32
  }
  func.func @transform_2(%arg0: i32) -> (i32, i32) {
    %c0_i32 = arith.constant 0 : i32
    %c0_i32_0 = arith.constant 0 : i32
    %c0_i32_1 = arith.constant 0 : i32
    return %c0_i32, %c0_i32_0 : i32, i32
  }
  func.func @transform_3(%arg0: i32) -> (i32, i32) {
    %c0_i32 = arith.constant 0 : i32
    %c0_i32_0 = arith.constant 0 : i32
    return %arg0, %c0_i32 : i32, i32
  }
}

</mosaic_0001>

<bundles_post_ra>
// kernel: base_classifier_forward.1
= control target key start
LH: loop header
LB: loop body
LE: loop exit
PB: predicated region body
PF: predicated region fallthrough
CT: control target
= control target key end

     0   :  { %v299_v1 = vmov 0.0   ;;  %vm300_vm0 = vmmov 0   ;;  %vm34_vm1 = vcmask 261120   ;;  %s367_s0 = inlined_call_operand.vmem [shape: f32[8,32], index: 0, kind: input, shape index: {}]   ;;  %s368_s1 = inlined_call_operand.vmem [shape: bf16[32,128], index: 1, kind: input, shape index: {}]   ;;  %s369_s2 = inlined_call_operand.vmem [shape: bf16[128,10], index: 2, kind: input, shape index: {}]   ;;  %s370_s3 = inlined_call_operand.hbm [shape: f32[8,10], index: 3, kind: output, shape index: {}]  }
   0x1   :  { %v261_v0 = vld [vmem:[%s368_s1] sm:$0xff]   ;;  %230 = vmatprep.subr.bf16.mxu0 %v299_v1  ;;  %v262_v2 = vld [vmem:[%s368_s1 + $0x8] sm:$0xff]   ;;  %238 = vmatprep.subr.bf16.mxu1 %v299_v1  ;;  %v265_v7 = vld [vmem:[%s369_s2 + $0x10] sm:$0xff]  }
   0x2   :  { %231 = vmatpush3.bf16.msra.mxu0 %v261_v0  ;;  %234 = vmatprep.mubr.msk.bf16.mxu0 %vm300_vm0, %v299_v1  ;;  %v16_v3 = vld [vmem:[%s367_s0] sm:$0xff]  ;;  %v264_v6 = vld [vmem:[%s369_s2 + $0x8] sm:$0xff]  }
   0x3   :  { %232 = vmatprep.subr.bf16.mxu0 %v299_v1  ;;  %v263_v4 = vld [vmem:[%s369_s2] sm:$0xff]   ;;  %254 = vmatprep.mubr.msk.bf16.mxu1 %vm300_vm0, %v299_v1  ;;  %v17_v5 = vpack.c.bf16 %v16_v3, %v16_v3 }
   0x4   :  { %239 = vmatpush3.bf16.msra.mxu1 %v263_v4 }
   0x5   :  { %240 = vmatprep.subr.bf16.mxu1 %v299_v1 }
   0x6   :  { %233 = vmatpush3.bf16.msra.mxu0 %v262_v2 }
   0x8   :  { %241 = vmatpush3.bf16.msra.mxu1 %v264_v6 }
   0x9   :  { %235 = vmatmul.mubr.msk.bf16.vlgmr.msra.gmra.mrb[0].mxu0 %vm34_vm1, %v17_v5  ;;  %242 = vmatprep.subr.bf16.mxu1 %v299_v1 }
   0xa   :  { %8 = vsyncpa [#allocation3], 0  ;;  %v266_v8 = vld [vmem:[%s369_s2 + $0x18] sm:$0xff]   ;;  %v267_v9 = vld [vmem:[%s369_s2 + $0x20] sm:$0xff]   ;;  %s301_s5 = smov [#allocation2]   ;;  %vm190_vm2 = vcmask 80896  }
   0xb   :  { %v268_v10 = vld [vmem:[%s369_s2 + $0x28] sm:$0xff]   ;;  %v269_v11 = vld [vmem:[%s369_s2 + $0x30] sm:$0xff]   ;;  %v270_v12 = vld [vmem:[%s369_s2 + $0x38] sm:$0xff]   ;;  %s198_s6 = sshll.u32 %s301_s5, 4  ;;  %s199_s6 = int_to_ptr.vmem [resolvable:$true] %s198_s6 }
   0xc   :  { %243 = vmatpush3.bf16.msra.mxu1 %v265_v7  ;;  %s275_s2 = scalar_lea.vmem %s199_s6, 128  ;;  %p280_p1 = scmp.lt.s32.totalorder %s199_s6, %s199_s6 }
   0xd   :  { %244 = vmatprep.subr.bf16.mxu1 %v299_v1  ;;  %p276_p0 = scmp.ne.s32.totalorder %s199_s6, %s275_s2  ;;  %p281_p2 = scmp.lt.s32.totalorder %s275_s2, %s275_s2 }
   0xf   :  { %p282_p3 = por %p281_p2, %p280_p1 }
  0x10   :  { %245 = vmatpush3.bf16.msra.mxu1 %v266_v8 }
  0x11   :  { %246 = vmatprep.subr.bf16.mxu1 %v299_v1  ;;  %p283_p4 = pnand %p282_p3, %p276_p0 }
  0x14   :  { %247 = vmatpush3.bf16.msra.mxu1 %v267_v9 }
  0x15   :  { %248 = vmatprep.subr.bf16.mxu1 %v299_v1 }
  0x18   :  { %249 = vmatpush3.bf16.msra.mxu1 %v268_v10 }
  0x19   :  { %250 = vmatprep.subr.bf16.mxu1 %v299_v1 }
  0x1c   :  { %251 = vmatpush3.bf16.msra.mxu1 %v269_v11 }
  0x1d   :  { %252 = vmatprep.subr.bf16.mxu1 %v299_v1 }
  0x20   :  { %253 = vmatpush3.bf16.msra.mxu1 %v270_v12 }
  0xdc   :  { %v72_v13 = vpop.f32.mrb[0].mxu0 }
  0xdd   :  { %v78_v14 = vmax.f32 %v72_v13, 0.0  ;;  %v236_v15 = vpop.f32.mrb[1].mxu0 }
  0xde   :  { %v75_v16 = vpop.f32.mrb[2].mxu0 }
  0xdf   :  { %v79_v17 = vpack.c.bf16 %v78_v14, %v78_v14  ;;  %v237_v18 = vpop.f32.mrb[3].mxu0 }
  0xe1   :  { %255 = vmatmul.mubr.bf16.vlgmr.msra.gmra.mrb[0].mxu1 %v79_v17 }
 0x1b4   :  { %v178_v19 = vpop.f32.mrb[0].mxu1 }
 0x1b5   :  { %v217_v20 = vmul.f32 -1.442695, %v178_v19  ;;  %v256_v21 = vpop.f32.mrb[1].mxu1 }
 0x1b6   :  { %v181_v22 = vpop.f32.mrb[2].mxu1 }
 0x1b7   :  { %271 = vpow2.f32 %v217_v20  ;;  %v257_v23 = vpop.f32.mrb[3].mxu1 }
 0x1c1   :  { %v272_v24 = vpop.eup %271 }
 0x1c2   :  { %v187_v25 = vadd.f32 1.0, %v272_v24 }
 0x1c4   :  { %273 = vrcp.f32 %v187_v25 }
 0x1ce   :  { %v274_v26 = vpop.eup %273 }
 0x1cf   :  { %191 = vst.msk [vmem:[#allocation2] sm:$0xff] %vm190_vm2, %v274_v26 }
 0x1d0   :  { %286 = shalt.err (!%p283_p4)
}
 0x1d1   :  { %s287_s9 = scalar_lea.hbm %s370_s3, 128 }
 0x1d2   :  { %p288_p5 = scmp.ne.s32.totalorder %s370_s3, %s287_s9  ;;  %p291_p6 = scmp.lt.u32.totalorder %s287_s9, %s370_s3 }
 0x1d4   :  { %p293_p7 = pnand %p291_p6, %p288_p5 }
 0x1d6   :  { %296 = shalt.err (!%p293_p7)
}
 0x1d7   :  { %201 = dma.vmem_to_hbm [thread:$0]  %s199_s6, 128, %s370_s3, [#allocation3]  }
 0x1d8   :  { %297 = dma.done.wait [#allocation3], 128  }
 0x1d9   :  { %298 = vsyncadd [#allocation3], 4294967168 }
 0x1da   :  { %205 = vsyncpa [#allocation3], 1 }

</bundles_post_ra>
